<compile_context>
chip_gen: v7x
topology: tpu7x:2x2x1
jax: 0.10.0
libtpu: 0.0.40
codegen_flags: <defaults>
</compile_context>

<pallas_src>
import jax
import jax.numpy as jnp
import numpy as np
from jax import lax
from jax.experimental import pallas as pl
from jax.experimental.pallas import tpu as pltpu

_K = 3                    # Conv1d kernel_size used throughout the module
_STRIDES = (1, 2, 2, 1)   # strides of the four conv layers in the Sequential


def _seq_lengths(seq_len):
    ls, l = [], seq_len
    for s in _STRIDES:
        l = (l - _K) // s + 1
        ls.append(l)
    assert ls[-1] == 1, (
        f"sequence length {seq_len} does not reduce to 1 ({ls}); "
        f"squeeze(dim=2) requires final length 1")
    return tuple(ls)


# ----------------------------- Pallas kernel ------------------------------ #
def _make_kernel(seq_len, conv_rows):
    """conv_rows[i] = K * C_in of conv layer i (static, for weight-slab slicing)."""
    l1, l2, l3, l4 = _seq_lengths(seq_len)

    def elu(v):
        # nn.ELU(alpha=1.0); exp runs on the (otherwise idle) EUP slot, f32.
        return jnp.where(v > 0, v, jnp.exp(v) - 1.0)

    def kernel(x_ref, wstack_ref, bias_ref, fcw_ref, out_ref):
        c_out = wstack_ref.shape[2]

        def conv_im2col(taps, layer):
            # taps: K values, each (L_out, B, C_in) f32.
            l_out, bsz, c_in = taps[0].shape
            lhs = jnp.concatenate(taps, axis=-1)           # (L_out, B, K*C_in)
            lhs = lhs.reshape(l_out * bsz, _K * c_in)      # tile-aligned (B % 8 == 0)
            w = wstack_ref[layer]                          # (rows_pad, C_out) f32
            rows = conv_rows[layer]
            if rows != w.shape[0]:
                w = w[:rows]                               # static, sublane-aligned
            # bf16 operands -> native MXU path; accumulate in f32.
            y = jnp.dot(lhs.astype(jnp.bfloat16), w.astype(jnp.bfloat16),
                        preferred_element_type=jnp.float32)
            y = elu(y + bias_ref[layer:layer + 1, 0:c_out])   # bias + ELU in f32
            return y.reshape(l_out, bsz, c_out)            # (L_out, B, C_out)

        def taps_stride1(h, l_out):
            # Contiguous leading-dim windows, one per tap.
            return [h[t:t + l_out] for t in range(_K)]

        def taps_stride2(h, l_out):
            # Positions {t, t+2, ..., t+2*(l_out-1)} for t = 0,1,2 without any
            # strided slicing: pair positions along the untiled leading dim.
            bsz, c = h.shape[1], h.shape[2]
            pairs = h[0:2 * l_out].reshape(l_out, 2, bsz, c)   # (2i, 2i+1) pairs
            t0, t1 = pairs[:, 0], pairs[:, 1]
            if l_out == 1:
                t2 = h[2:3]
            else:
                # tap 2 = positions 2,4,...,2*l_out: tap 0 shifted one window,
                # plus the final position (leading-dim ops only, no 2nd copy).
                t2 = jnp.concatenate([pairs[1:, 0], h[2 * l_out:2 * l_out + 1]],
                                     axis=0)
            return [t0, t1, t2]

        x = x_ref[...]                                     # (L, B, C_in) f32
        h1 = conv_im2col(taps_stride1(x, l1), 0)           # (l1, B, C)
        h2 = conv_im2col(taps_stride2(h1, l2), 1)          # (l2, B, C)
        h3 = conv_im2col(taps_stride2(h2, l3), 2)          # (l3, B, C)
        h4 = conv_im2col(taps_stride1(h3, l4), 3)          # (1,  B, C)

        feats = h4[0]                                      # (B, C) == squeeze(dim=2)
        logits = jnp.dot(feats.astype(jnp.bfloat16), fcw_ref[...],
                         preferred_element_type=jnp.float32)   # (B, 128) f32
        out_ref[...] = logits + bias_ref[4:5, :]           # lane-dense unmasked store

    return kernel


# ------------------------------ JAX wrapper ------------------------------- #
def surname_classifier_forward(x_ncw, params):
    """x_ncw: (B, initial_num_channels, L) float32 (PyTorch NCW layout).
       Returns logits (B, num_classes) — the apply_softmax=False path."""
    (w1, b1), (w2, b2), (w3, b3), (w4, b4), (fcw, fcb) = params
    B, _, L = x_ncw.shape
    num_channels = w1.shape[0]
    num_classes = fcw.shape[0]
    assert num_channels <= 128 and num_classes <= 128

    l1, l2, l3, l4 = _seq_lengths(L)
    b_pad = ((B + 7) // 8) * 8          # batch on sublanes, multiple of 8
    n_lanes = 128                       # lane-dense classifier output

    # ---- layout-only glue; all arithmetic stays in the kernel ------------ #
    x_lbc = jnp.transpose(x_ncw, (2, 0, 1)).astype(jnp.float32)   # (L, B, C_in)
    if b_pad != B:
        x_lbc = jnp.pad(x_lbc, ((0, 0), (0, b_pad - B), (0, 0)))

    def conv_w(w):   # (C_out, C_in, K) -> (K*C_in, C_out), tap-major rows
        return jnp.transpose(w, (2, 1, 0)).reshape(-1, w.shape[0])

    slabs = [conv_w(w1), conv_w(w2), conv_w(w3), conv_w(w4)]
    conv_rows = tuple(s.shape[0] for s in slabs)
    rows_pad = ((max(conv_rows) + 7) // 8) * 8
    wstack = jnp.stack(
        [jnp.pad(s, ((0, rows_pad - s.shape[0]), (0, 0))) for s in slabs])
    # wstack: (4, rows_pad, num_channels) f32

    bias_pack = jnp.zeros((8, n_lanes), jnp.float32)       # one (8,128) tile
    for i, b in enumerate((b1, b2, b3, b4)):
        bias_pack = bias_pack.at[i, :num_channels].set(b)
    bias_pack = bias_pack.at[4, :num_classes].set(fcb)

    fcw_pad = jnp.zeros((num_channels, n_lanes), jnp.float32)
    fcw_pad = fcw_pad.at[:, :num_classes].set(jnp.transpose(fcw, (1, 0)))
    fcw_pad = fcw_pad.astype(jnp.bfloat16)                 # used directly by the MXU

    # Advisory scheduling hint for XLA around this small custom call.
    m_rows = [l1 * b_pad, l2 * b_pad, l3 * b_pad, l4 * b_pad]
    flops = 2 * (sum(m * r * num_channels for m, r in zip(m_rows, conv_rows))
                 + b_pad * num_channels * n_lanes)
    transcendentals = sum(m * num_channels for m in m_rows)        # ELU exp lanes
    bytes_accessed = 4 * (x_lbc.size + wstack.size + bias_pack.size
                          + b_pad * n_lanes) + 2 * fcw_pad.size
    cost = pl.CostEstimate(flops=flops, transcendentals=transcendentals,
                           bytes_accessed=bytes_accessed)

    kernel = _make_kernel(L, conv_rows)
    vmem = pl.BlockSpec(memory_space=pltpu.MemorySpace.VMEM)

    # Gridless single invocation: 4 input DMAs, everything VMEM-resident.
    # For production batches >> 8 add a 1-D batch grid with
    # dimension_semantics=("parallel",) (uses both v7x TensorCores) and weight
    # index_maps returning block 0 so the slabs stay VMEM-resident.
    out = pl.pallas_call(
        kernel,
        out_shape=jax.ShapeDtypeStruct((b_pad, n_lanes), jnp.float32),
        in_specs=[vmem] * 4,
        out_specs=vmem,
        cost_estimate=cost,
    )(x_lbc, wstack, bias_pack, fcw_pad)
    return out[:B, :num_classes]


# --------------------------- pure-JAX reference ---------------------------- #
def reference_forward(x_ncw, params):
    (w1, b1), (w2, b2), (w3, b3), (w4, b4), (fcw, fcb) = params

    def elu(v):
        return jnp.where(v > 0, v, jnp.exp(v) - 1.0)

    def conv(h, w, b, stride):
        y = lax.conv_general_dilated(
            h, w, window_strides=(stride,), padding='VALID',
            dimension_numbers=('NCW', 'OIW', 'NCW'),
            precision=lax.Precision.HIGHEST)
        return elu(y + b[None, :, None])

    h = conv(x_ncw, w1, b1, 1)
    h = conv(h, w2, b2, 2)
    h = conv(h, w3, b3, 2)
    h = conv(h, w4, b4, 1)          # (B, C, 1)
    feats = h[:, :, 0]
    return feats @ fcw.T + fcb


# ------------------------------- parameters -------------------------------- #
def init_params(key, initial_num_channels, num_classes, num_channels, k=_K):
    def uniform(key, shape, fan_in):
        bound = 1.0 / np.sqrt(fan_in)
        return jax.random.uniform(key, shape, jnp.float32, -bound, bound)

    keys = jax.random.split(key, 10)
    params = []
    cin = initial_num_channels
    for i in range(4):
        w = uniform(keys[2 * i], (num_channels, cin, k), cin * k)
        b = uniform(keys[2 * i + 1], (num_channels,), cin * k)
        params.append((w, b))
        cin = num_channels
    fcw = uniform(keys[8], (num_classes, num_channels), num_channels)
    fcb = uniform(keys[9], (num_classes,), num_channels)
    params.append((fcw, fcb))
    return params


# ---------------------------------- main ----------------------------------- #
if __name__ == "__main__":
    # L=17 so the conv stack reduces the sequence to length 1 (15 -> 7 -> 3 -> 1),
    # matching the squeeze(dim=2) in the PyTorch module.
    batch = 4
    initial_num_channels = 8
    num_channels = 32
    num_classes = 10
    seq_len = 17

    key = jax.random.PRNGKey(0)
    key_x, key_p = jax.random.split(key)
    x = jax.random.normal(key_x, (batch, initial_num_channels, seq_len), jnp.float32)
    params = init_params(key_p, initial_num_channels, num_classes, num_channels)

    logits = surname_classifier_forward(x, params)
    logits = jax.block_until_ready(logits)

    ref = jax.block_until_ready(reference_forward(x, params))
    assert logits.shape == (batch, num_classes)
    # Kernel uses bf16 MXU operands (f32 accumulation); reference is pure f32,
    # so allow bf16-operand rounding across the 5 stacked matmuls.
    np.testing.assert_allclose(np.asarray(logits), np.asarray(ref),
                               rtol=2e-2, atol=2e-2)

    print("KERNEL_OK")
</pallas_src>

<mosaic_0001>
module attributes {stable_mosaic.version = 11 : i64} {
  func.func @kernel(%arg0: memref<17x8x8xf32, #tpu.memory_space<vmem>>, %arg1: memref<4x96x32xf32, #tpu.memory_space<vmem>>, %arg2: memref<8x128xf32, #tpu.memory_space<vmem>>, %arg3: memref<32x128xbf16, #tpu.memory_space<vmem>>, %arg4: memref<8x128xf32, #tpu.memory_space<vmem>>) attributes {dimension_semantics = [], scalar_prefetch = 0 : i64, scratch_operands = 0 : i64, tpu.core_type = #tpu.core_type<tc>} {
    %c0 = arith.constant 0 : index
    %c0_0 = arith.constant 0 : index
    %c0_1 = arith.constant 0 : index
    %0 = vector.load %arg0[%c0, %c0_0, %c0_1] : memref<17x8x8xf32, #tpu.memory_space<vmem>>, vector<17x8x8xf32>
    %1 = vector.extract_strided_slice %0 {offsets = [0, 0, 0], sizes = [15, 8, 8], strides = [1, 1, 1]} : vector<17x8x8xf32> to vector<15x8x8xf32>
    %2 = vector.extract_strided_slice %0 {offsets = [1, 0, 0], sizes = [15, 8, 8], strides = [1, 1, 1]} : vector<17x8x8xf32> to vector<15x8x8xf32>
    %3 = vector.extract_strided_slice %0 {offsets = [2, 0, 0], sizes = [15, 8, 8], strides = [1, 1, 1]} : vector<17x8x8xf32> to vector<15x8x8xf32>
    %4 = tpu.concatenate %1, %2, %3 in 2 : vector<15x8x8xf32>, vector<15x8x8xf32>, vector<15x8x8xf32> -> vector<15x8x24xf32>
    %5 = vector.shape_cast %4 : vector<15x8x24xf32> to vector<120x24xf32>
    %c0_2 = arith.constant 0 : index
    %c0_3 = arith.constant 0 : index
    %c0_4 = arith.constant 0 : index
    %6 = vector.load %arg1[%c0_2, %c0_3, %c0_4] : memref<4x96x32xf32, #tpu.memory_space<vmem>>, vector<1x96x32xf32>
    %7 = vector.shape_cast %6 : vector<1x96x32xf32> to vector<96x32xf32>
    %8 = vector.extract_strided_slice %7 {offsets = [0, 0], sizes = [24, 32], strides = [1, 1]} : vector<96x32xf32> to vector<24x32xf32>
    %9 = arith.truncf %5 : vector<120x24xf32> to vector<120x24xbf16>
    %10 = arith.truncf %8 : vector<24x32xf32> to vector<24x32xbf16>
    %cst = arith.constant dense<0.000000e+00> : vector<120x32xf32>
    %11 = tpu.matmul %9, %10, %cst {dimension_numbers = #tpu.dot_dimension_numbers<[1], [0], [0], [1], [0, 0, 1, 1], [], []>} : vector<120x24xbf16>, vector<24x32xbf16>, vector<120x32xf32> -> vector<120x32xf32>
    %c0_5 = arith.constant 0 : index
    %c0_6 = arith.constant 0 : index
    %12 = vector.load %arg2[%c0_5, %c0_6] : memref<8x128xf32, #tpu.memory_space<vmem>>, vector<1x32xf32>
    %13 = vector.broadcast %12 : vector<1x32xf32> to vector<120x32xf32>
    %14 = arith.addf %11, %13 : vector<120x32xf32>
    %cst_7 = arith.constant 0.000000e+00 : f32
    %15 = vector.broadcast %cst_7 : f32 to vector<120x32xf32>
    %16 = arith.cmpf ogt, %14, %15 : vector<120x32xf32>
    %17 = math.exp %14 : vector<120x32xf32>
    %cst_8 = arith.constant 1.000000e+00 : f32
    %18 = vector.broadcast %cst_8 : f32 to vector<120x32xf32>
    %19 = arith.subf %17, %18 : vector<120x32xf32>
    %20 = arith.select %16, %14, %19 : vector<120x32xi1>, vector<120x32xf32>
    %21 = vector.shape_cast %20 : vector<120x32xf32> to vector<15x8x32xf32>
    %22 = vector.extract_strided_slice %21 {offsets = [0, 0, 0], sizes = [14, 8, 32], strides = [1, 1, 1]} : vector<15x8x32xf32> to vector<14x8x32xf32>
    %23 = vector.shape_cast %22 : vector<14x8x32xf32> to vector<7x2x8x32xf32>
    %24 = vector.extract_strided_slice %23 {offsets = [0, 0, 0, 0], sizes = [7, 1, 8, 32], strides = [1, 1, 1, 1]} : vector<7x2x8x32xf32> to vector<7x1x8x32xf32>
    %25 = vector.shape_cast %24 : vector<7x1x8x32xf32> to vector<7x8x32xf32>
    %26 = vector.extract_strided_slice %23 {offsets = [0, 1, 0, 0], sizes = [7, 1, 8, 32], strides = [1, 1, 1, 1]} : vector<7x2x8x32xf32> to vector<7x1x8x32xf32>
    %27 = vector.shape_cast %26 : vector<7x1x8x32xf32> to vector<7x8x32xf32>
    %28 = vector.extract_strided_slice %23 {offsets = [1, 0, 0, 0], sizes = [6, 1, 8, 32], strides = [1, 1, 1, 1]} : vector<7x2x8x32xf32> to vector<6x1x8x32xf32>
    %29 = vector.shape_cast %28 : vector<6x1x8x32xf32> to vector<6x8x32xf32>
    %30 = vector.extract_strided_slice %21 {offsets = [14, 0, 0], sizes = [1, 8, 32], strides = [1, 1, 1]} : vector<15x8x32xf32> to vector<1x8x32xf32>
    %31 = tpu.concatenate %29, %30 in 0 : vector<6x8x32xf32>, vector<1x8x32xf32> -> vector<7x8x32xf32>
    %32 = tpu.concatenate %25, %27, %31 in 2 : vector<7x8x32xf32>, vector<7x8x32xf32>, vector<7x8x32xf32> -> vector<7x8x96xf32>
    %33 = vector.shape_cast %32 : vector<7x8x96xf32> to vector<56x96xf32>
    %c1 = arith.constant 1 : index
    %c0_9 = arith.constant 0 : index
    %c0_10 = arith.constant 0 : index
    %34 = vector.load %arg1[%c1, %c0_9, %c0_10] : memref<4x96x32xf32, #tpu.memory_space<vmem>>, vector<1x96x32xf32>
    %35 = vector.shape_cast %34 : vector<1x96x32xf32> to vector<96x32xf32>
    %36 = arith.truncf %33 : vector<56x96xf32> to vector<56x96xbf16>
    %37 = arith.truncf %35 : vector<96x32xf32> to vector<96x32xbf16>
    %cst_11 = arith.constant dense<0.000000e+00> : vector<56x32xf32>
    %38 = tpu.matmul %36, %37, %cst_11 {dimension_numbers = #tpu.dot_dimension_numbers<[1], [0], [0], [1], [0, 0, 1, 1], [], []>} : vector<56x96xbf16>, vector<96x32xbf16>, vector<56x32xf32> -> vector<56x32xf32>
    %c1_12 = arith.constant 1 : index
    %c0_13 = arith.constant 0 : index
    %39 = vector.load %arg2[%c1_12, %c0_13] : memref<8x128xf32, #tpu.memory_space<vmem>>, vector<1x32xf32>
    %40 = vector.broadcast %39 : vector<1x32xf32> to vector<56x32xf32>
    %41 = arith.addf %38, %40 : vector<56x32xf32>
    %cst_14 = arith.constant 0.000000e+00 : f32
    %42 = vector.broadcast %cst_14 : f32 to vector<56x32xf32>
    %43 = arith.cmpf ogt, %41, %42 : vector<56x32xf32>
    %44 = math.exp %41 : vector<56x32xf32>
    %cst_15 = arith.constant 1.000000e+00 : f32
    %45 = vector.broadcast %cst_15 : f32 to vector<56x32xf32>
    %46 = arith.subf %44, %45 : vector<56x32xf32>
    %47 = arith.select %43, %41, %46 : vector<56x32xi1>, vector<56x32xf32>
    %48 = vector.shape_cast %47 : vector<56x32xf32> to vector<7x8x32xf32>
    %49 = vector.extract_strided_slice %48 {offsets = [0, 0, 0], sizes = [6, 8, 32], strides = [1, 1, 1]} : vector<7x8x32xf32> to vector<6x8x32xf32>
    %50 = vector.shape_cast %49 : vector<6x8x32xf32> to vector<3x2x8x32xf32>
    %51 = vector.extract_strided_slice %50 {offsets = [0, 0, 0, 0], sizes = [3, 1, 8, 32], strides = [1, 1, 1, 1]} : vector<3x2x8x32xf32> to vector<3x1x8x32xf32>
    %52 = vector.shape_cast %51 : vector<3x1x8x32xf32> to vector<3x8x32xf32>
    %53 = vector.extract_strided_slice %50 {offsets = [0, 1, 0, 0], sizes = [3, 1, 8, 32], strides = [1, 1, 1, 1]} : vector<3x2x8x32xf32> to vector<3x1x8x32xf32>
    %54 = vector.shape_cast %53 : vector<3x1x8x32xf32> to vector<3x8x32xf32>
    %55 = vector.extract_strided_slice %50 {offsets = [1, 0, 0, 0], sizes = [2, 1, 8, 32], strides = [1, 1, 1, 1]} : vector<3x2x8x32xf32> to vector<2x1x8x32xf32>
    %56 = vector.shape_cast %55 : vector<2x1x8x32xf32> to vector<2x8x32xf32>
    %57 = vector.extract_strided_slice %48 {offsets = [6, 0, 0], sizes = [1, 8, 32], strides = [1, 1, 1]} : vector<7x8x32xf32> to vector<1x8x32xf32>
    %58 = tpu.concatenate %56, %57 in 0 : vector<2x8x32xf32>, vector<1x8x32xf32> -> vector<3x8x32xf32>
    %59 = tpu.concatenate %52, %54, %58 in 2 : vector<3x8x32xf32>, vector<3x8x32xf32>, vector<3x8x32xf32> -> vector<3x8x96xf32>
    %60 = vector.shape_cast %59 : vector<3x8x96xf32> to vector<24x96xf32>
    %c2 = arith.constant 2 : index
    %c0_16 = arith.constant 0 : index
    %c0_17 = arith.constant 0 : index
    %61 = vector.load %arg1[%c2, %c0_16, %c0_17] : memref<4x96x32xf32, #tpu.memory_space<vmem>>, vector<1x96x32xf32>
    %62 = vector.shape_cast %61 : vector<1x96x32xf32> to vector<96x32xf32>
    %63 = arith.truncf %60 : vector<24x96xf32> to vector<24x96xbf16>
    %64 = arith.truncf %62 : vector<96x32xf32> to vector<96x32xbf16>
    %cst_18 = arith.constant dense<0.000000e+00> : vector<24x32xf32>
    %65 = tpu.matmul %63, %64, %cst_18 {dimension_numbers = #tpu.dot_dimension_numbers<[1], [0], [0], [1], [0, 0, 1, 1], [], []>} : vector<24x96xbf16>, vector<96x32xbf16>, vector<24x32xf32> -> vector<24x32xf32>
    %c2_19 = arith.constant 2 : index
    %c0_20 = arith.constant 0 : index
    %66 = vector.load %arg2[%c2_19, %c0_20] : memref<8x128xf32, #tpu.memory_space<vmem>>, vector<1x32xf32>
    %67 = vector.broadcast %66 : vector<1x32xf32> to vector<24x32xf32>
    %68 = arith.addf %65, %67 : vector<24x32xf32>
    %cst_21 = arith.constant 0.000000e+00 : f32
    %69 = vector.broadcast %cst_21 : f32 to vector<24x32xf32>
    %70 = arith.cmpf ogt, %68, %69 : vector<24x32xf32>
    %71 = math.exp %68 : vector<24x32xf32>
    %cst_22 = arith.constant 1.000000e+00 : f32
    %72 = vector.broadcast %cst_22 : f32 to vector<24x32xf32>
    %73 = arith.subf %71, %72 : vector<24x32xf32>
    %74 = arith.select %70, %68, %73 : vector<24x32xi1>, vector<24x32xf32>
    %75 = vector.shape_cast %74 : vector<24x32xf32> to vector<3x8x32xf32>
    %76 = vector.extract_strided_slice %75 {offsets = [0, 0, 0], sizes = [1, 8, 32], strides = [1, 1, 1]} : vector<3x8x32xf32> to vector<1x8x32xf32>
    %77 = vector.extract_strided_slice %75 {offsets = [1, 0, 0], sizes = [1, 8, 32], strides = [1, 1, 1]} : vector<3x8x32xf32> to vector<1x8x32xf32>
    %78 = vector.extract_strided_slice %75 {offsets = [2, 0, 0], sizes = [1, 8, 32], strides = [1, 1, 1]} : vector<3x8x32xf32> to vector<1x8x32xf32>
    %79 = tpu.concatenate %76, %77, %78 in 2 : vector<1x8x32xf32>, vector<1x8x32xf32>, vector<1x8x32xf32> -> vector<1x8x96xf32>
    %80 = vector.shape_cast %79 : vector<1x8x96xf32> to vector<8x96xf32>
    %c3 = arith.constant 3 : index
    %c0_23 = arith.constant 0 : index
    %c0_24 = arith.constant 0 : index
    %81 = vector.load %arg1[%c3, %c0_23, %c0_24] : memref<4x96x32xf32, #tpu.memory_space<vmem>>, vector<1x96x32xf32>
    %82 = vector.shape_cast %81 : vector<1x96x32xf32> to vector<96x32xf32>
    %83 = arith.truncf %80 : vector<8x96xf32> to vector<8x96xbf16>
    %84 = arith.truncf %82 : vector<96x32xf32> to vector<96x32xbf16>
    %cst_25 = arith.constant dense<0.000000e+00> : vector<8x32xf32>
    %85 = tpu.matmul %83, %84, %cst_25 {dimension_numbers = #tpu.dot_dimension_numbers<[1], [0], [0], [1], [0, 0, 1, 1], [], []>} : vector<8x96xbf16>, vector<96x32xbf16>, vector<8x32xf32> -> vector<8x32xf32>
    %c3_26 = arith.constant 3 : index
    %c0_27 = arith.constant 0 : index
    %86 = vector.load %arg2[%c3_26, %c0_27] : memref<8x128xf32, #tpu.memory_space<vmem>>, vector<1x32xf32>
    %87 = vector.broadcast %86 : vector<1x32xf32> to vector<8x32xf32>
    %88 = arith.addf %85, %87 : vector<8x32xf32>
    %cst_28 = arith.constant 0.000000e+00 : f32
    %89 = vector.broadcast %cst_28 : f32 to vector<8x32xf32>
    %90 = arith.cmpf ogt, %88, %89 : vector<8x32xf32>
    %91 = math.exp %88 : vector<8x32xf32>
    %cst_29 = arith.constant 1.000000e+00 : f32
    %92 = vector.broadcast %cst_29 : f32 to vector<8x32xf32>
    %93 = arith.subf %91, %92 : vector<8x32xf32>
    %94 = arith.select %90, %88, %93 : vector<8x32xi1>, vector<8x32xf32>
    %95 = vector.shape_cast %94 : vector<8x32xf32> to vector<1x8x32xf32>
    %96 = vector.shape_cast %95 : vector<1x8x32xf32> to vector<8x32xf32>
    %97 = arith.truncf %96 : vector<8x32xf32> to vector<8x32xbf16>
    %c0_30 = arith.constant 0 : index
    %c0_31 = arith.constant 0 : index
    %98 = vector.load %arg3[%c0_30, %c0_31] : memref<32x128xbf16, #tpu.memory_space<vmem>>, vector<32x128xbf16>
    %cst_32 = arith.constant dense<0.000000e+00> : vector<8x128xf32>
    %99 = tpu.matmul %97, %98, %cst_32 {dimension_numbers = #tpu.dot_dimension_numbers<[1], [0], [0], [1], [0, 0, 1, 1], [], []>} : vector<8x32xbf16>, vector<32x128xbf16>, vector<8x128xf32> -> vector<8x128xf32>
    %c4 = arith.constant 4 : index
    %c0_33 = arith.constant 0 : index
    %100 = vector.load %arg2[%c4, %c0_33] : memref<8x128xf32, #tpu.memory_space<vmem>>, vector<1x128xf32>
    %101 = vector.broadcast %100 : vector<1x128xf32> to vector<8x128xf32>
    %102 = arith.addf %99, %101 : vector<8x128xf32>
    %c0_34 = arith.constant 0 : index
    %c0_35 = arith.constant 0 : index
    %103 = vector.load %arg4[%c0_34, %c0_35] : memref<8x128xf32, #tpu.memory_space<vmem>>, vector<8x128xf32>
    tpu.vector_store %arg4[%c0_34, %c0_35], %102 {strides = array<i32>} : memref<8x128xf32, #tpu.memory_space<vmem>>, vector<8x128xf32>,
    return
  }
}

</mosaic_0001>

<bundles_post_ra>
// kernel: tpu_custom_call.1
= control target key start
LH: loop header
LB: loop body
LE: loop exit
PB: predicated region body
PF: predicated region fallthrough
CT: control target
= control target key end

     0   :  { %s1291_s25 = smov 16   ;;  %s1292_s26 = smov 8   ;;  %vm217_vm0 = vcmask 1043456   ;;  %s1796_s0 = inlined_call_operand.vmem [shape: f32[17,8,8], index: 0, kind: input, shape index: {}]   ;;  %s1797_s1 = inlined_call_operand.vmem [shape: f32[4,96,32], index: 1, kind: input, shape index: {}]   ;;  %s1798_s2 = inlined_call_operand.vmem [shape: f32[8,128], index: 2, kind: input, shape index: {}]   ;;  %s1799_s3 = inlined_call_operand.vmem [shape: bf16[32,128], index: 3, kind: input, shape index: {}]   ;;  %s1800_s4 = inlined_call_operand.hbm [shape: f32[8,128], index: 4, kind: output, shape index: {}]  }
   0x1   :  { %v1326_v0 = vld [vmem:[%s1796_s0 + $0x10] sm:$0xff]  ;;  %v1331_v1 = vld [vmem:[%s1796_s0 + $0x18] sm:$0xff]  ;;  %v1336_v2 = vld [vmem:[%s1796_s0 + $0x8] sm:$0xff] }
   0x2   :  { %v1113_v3 = vpack.i.bf16 %v1331_v1, %v1326_v0  ;;  %v1103_v4 = vpack.i.bf16 %v1326_v0, %v1336_v2  ;;  %v1345_v5 = vld [vmem:[%s1796_s0 + $0x20] sm:$0xff]  ;;  %v1350_v6 = vld [vmem:[%s1796_s0 + $0x28] sm:$0xff]  ;;  %v1361_v9 = vld [vmem:[%s1796_s0 + $0x38] sm:$0xff] }
   0x3   :  { %v1118_v7 = vpack.i.bf16 %v1350_v6, %v1345_v5  ;;  %v1108_v8 = vpack.i.bf16 %v1345_v5, %v1331_v1  ;;  %v1366_v10 = vld [vmem:[%s1796_s0 + $0x40] sm:$0xff]  ;;  %v1371_v11 = vld [vmem:[%s1796_s0 + $0x30] sm:$0xff]  ;;  %v1381_v14 = vld [vmem:[%s1796_s0 + $0x48] sm:$0xff] }
   0x4   :  { %1114 = vrot.lane.b32.xlu1 %v1113_v3, %s1291_s25  ;;  %1104 = vrot.lane.b32.xlu0 %v1103_v4, %s1292_s26  ;;  %v174_v12 = vld [vmem:[%s1797_s1] sm:$0xff]  ;;  %v1128_v13 = vpack.i.bf16 %v1366_v10, %v1361_v9  ;;  %v175_v15 = vld [vmem:[%s1797_s1 + $0x8] sm:$0xff]  ;;  %v1123_v17 = vpack.i.bf16 %v1371_v11, %v1350_v6 }
   0x5   :  { %v176_v16 = vld [vmem:[%s1797_s1 + $0x10] sm:$0xff]  ;;  %v185_v18 = vpack.c.bf16 %v175_v15, %v174_v12 }
   0x6   :  { %v186_v19 = vpack.c.bf16 %v176_v16, %v176_v16 }
   0x8   :  { %1119 = vrot.lane.b32.xlu1 %v1118_v7, %s1291_s25  ;;  %1109 = vrot.lane.b32.xlu0 %v1108_v8, %s1292_s26 }
   0x9   :  { %9 = vsyncpa [#allocation3], 0  ;;  %1015 = vmatprep.subr.bf16.mxu0 %v185_v18  ;;  %v1138_v20 = vpack.i.bf16 %v1381_v14, %v1366_v10  ;;  %v1133_v21 = vpack.i.bf16 %v1361_v9, %v1371_v11  ;;  %v219_v22 = vsel %vm217_vm0, %v186_v19, 0  ;;  %v1402_v23 = vld [vmem:[%s1796_s0 + $0x58] sm:$0xff]  ;;  %v1407_v24 = vld [vmem:[%s1796_s0 + $0x60] sm:$0xff]  ;;  %vm142_vm1 = vcmask 64512  }
   0xa   :  { %1016 = vmatpush3.bf16.msra.mxu0 %v185_v18  ;;  %v1412_v25 = vld [vmem:[%s1796_s0 + $0x50] sm:$0xff]  ;;  %v1148_v26 = vpack.i.bf16 %v1407_v24, %v1402_v23  ;;  %v1423_v28 = vld [vmem:[%s1796_s0 + $0x68] sm:$0xff]  ;;  %v34_v33 = vld [vmem:[%s1796_s0 + $0x78] sm:$0xff]  ;;  %vm158_vm2 = vcmask 130048   ;;  %vm192_vm3 = vcmask 195584   ;;  %s1293_s6 = smov 32  }
   0xb   :  { %1095 = vmatprep.subr.msk.bf16.mxu0 %vm217_vm0, %v186_v19  ;;  %v1143_v27 = vpack.i.bf16 %v1412_v25, %v1381_v14  ;;  %v1158_v29 = vpack.i.bf16 %v1423_v28, %v1407_v24  ;;  %v1153_v30 = vpack.i.bf16 %v1402_v23, %v1412_v25  ;;  %v1434_v31 = vld [vmem:[%s1796_s0 + $0x70] sm:$0xff]  ;;  %v35_v35 = vld [vmem:[%s1796_s0 + $0x80] sm:$0xff]  ;;  %s1297_s11 = smov [#allocation2]  }
   0xc   :  { %1129 = vrot.lane.b32.xlu1 %v1128_v13, %s1292_s26  ;;  %1124 = vrot.lane.b32.xlu0 %v1123_v17, %s1292_s26  ;;  %v1163_v32 = vpack.i.bf16 %v1434_v31, %v1423_v28  ;;  %v1168_v34 = vpack.i.bf16 %v34_v33, %v1434_v31  ;;  %v19_v38 = vld [vmem:[%s1796_s0] sm:$0xff]  ;;  %s1294_s0 = smov 64   ;;  %s884_s12 = sshll.u32 %s1297_s11, 4  ;;  %s885_s12 = int_to_ptr.vmem [resolvable:$true] %s884_s12 }
   0xd   :  { %s1267_s13 = scalar_lea.vmem %s885_s12, 128  ;;  %p1272_p1 = scmp.lt.s32.totalorder %s885_s12, %s885_s12 }
   0xe   :  { %1018 = vmatpush3.bf16.msra.mxu0 %v219_v22  ;;  %p1268_p0 = scmp.ne.s32.totalorder %s885_s12, %s1267_s13  ;;  %p1273_p2 = scmp.lt.s32.totalorder %s1267_s13, %s1267_s13 }
  0x10   :  { %1139 = vrot.lane.b32.xlu1 %v1138_v20, %s1291_s25  ;;  %1134 = vrot.lane.b32.xlu0 %v1133_v21, %s1291_s25  ;;  %p1274_p3 = por %p1273_p2, %p1272_p1 }
  0x12   :  { %p1275_p4 = pnand %p1274_p3, %p1268_p0 }
  0x14   :  { %1149 = vrot.lane.b32.xlu1 %v1148_v26, %s1292_s26  ;;  %1144 = vrot.lane.b32.xlu0 %v1143_v27, %s1292_s26 }
  0x18   :  { %1159 = vrot.lane.b32.xlu1 %v1158_v29, %s1291_s25  ;;  %1154 = vrot.lane.b32.xlu0 %v1153_v30, %s1291_s25 }
  0x1c   :  { %79 = vrot.lane.b32.xlu1 %v34_v33, %s1292_s26  ;;  %1164 = vrot.lane.b32.xlu0 %v1163_v32, %s1292_s26 }
  0x20   :  { %125 = vrot.lane.b32.xlu1 %v35_v35, %s1291_s25  ;;  %1169 = vrot.lane.b32.xlu0 %v1168_v34, %s1291_s25 }
  0x76   :  { %v1115_v36 = vpop.permute.xlu1 %1114  ;;  %v1105_v37 = vpop.permute.xlu0 %1104 }
  0x77   :  { %v1117_v39 = vunpack.i.h.bf16 %v1115_v36  ;;  %v1116_v40 = vunpack.i.l.bf16 %v1115_v36  ;;  %v1107_v41 = vunpack.i.h.bf16 %v1105_v37  ;;  %v1106_v42 = vunpack.i.l.bf16 %v1105_v37 }
  0x79   :  { %v143_v43 = vsel %vm142_vm1, %v19_v38, %v1106_v42  ;;  %v144_v44 = vsel %vm142_vm1, %v1336_v2, %v1107_v41 }
  0x7a   :  { %v1120_v45 = vpop.permute.xlu1 %1119  ;;  %v1110_v46 = vpop.permute.xlu0 %1109  ;;  %v159_v47 = vsel %vm158_vm2, %v143_v43, %v1116_v40  ;;  %v160_v48 = vsel %vm158_vm2, %v144_v44, %v1117_v39 }
  0x7b   :  { %v1122_v49 = vunpack.i.h.bf16 %v1120_v45  ;;  %v1121_v50 = vunpack.i.l.bf16 %v1120_v45  ;;  %v1112_v51 = vunpack.i.h.bf16 %v1110_v46  ;;  %v1111_v52 = vunpack.i.l.bf16 %v1110_v46 }
  0x7c   :  { %v177_v53 = vpack.c.bf16 %v160_v48, %v159_v47 }
  0x7d   :  { %v146_v54 = vsel %vm142_vm1, %v1331_v1, %v1112_v51  ;;  %v145_v55 = vsel %vm142_vm1, %v1326_v0, %v1111_v52 }
  0x7e   :  { %1019 = vmatprep.mubr.msk.bf16.mxu0 %vm192_vm3, %v177_v53  ;;  %v1130_v56 = vpop.permute.xlu1 %1129  ;;  %v1125_v57 = vpop.permute.xlu0 %1124  ;;  %v161_v58 = vsel %vm158_vm2, %v145_v55, %v1121_v50  ;;  %v162_v59 = vsel %vm158_vm2, %v146_v54, %v1122_v49 }
  0x7f   :  { %v1132_v60 = vunpack.i.h.bf16 %v1130_v56  ;;  %v1131_v61 = vunpack.i.l.bf16 %v1130_v56  ;;  %v1127_v62 = vunpack.i.h.bf16 %v1125_v57  ;;  %v1126_v63 = vunpack.i.l.bf16 %v1125_v57  ;;  %v916_v57 = vld [vmem:[%s1797_s1 + $0x60] sm:$0xff] }
  0x80   :  { %v178_v2 = vpack.c.bf16 %v162_v59, %v161_v58  ;;  %v919_v59 = vld [vmem:[%s1797_s1 + $0x78] sm:$0xff] }
  0x81   :  { %v150_v12 = vsel %vm142_vm1, %v1361_v9, %v1132_v60  ;;  %v149_v13 = vsel %vm142_vm1, %v1371_v11, %v1131_v61  ;;  %v148_v15 = vsel %vm142_vm1, %v1350_v6, %v1127_v62  ;;  %v147_v16 = vsel %vm142_vm1, %v1345_v5, %v1126_v63  ;;  %v1521_v61 = vld [vmem:[%s1798_s2] ss:$0 sm:$0xff] }
  0x82   :  { %1020 = vmatmul.mubr.msk.bf16.vlgmr.msra.gmra.mrb[0].mxu0 %vm192_vm3, %v178_v2  ;;  %v1140_v3 = vpop.permute.xlu1 %1139  ;;  %v1135_v1 = vpop.permute.xlu0 %1134 }
  0x83   :  { %v1142_v4 = vunpack.i.h.bf16 %v1140_v3  ;;  %v1141_v7 = vunpack.i.l.bf16 %v1140_v3  ;;  %v1137_v0 = vunpack.i.h.bf16 %v1135_v1  ;;  %v1136_v8 = vunpack.i.l.bf16 %v1135_v1 }
  0x85   :  { %v165_v17 = vsel %vm158_vm2, %v149_v13, %v1141_v7  ;;  %v166_v18 = vsel %vm158_vm2, %v150_v12, %v1142_v4  ;;  %v163_v19 = vsel %vm158_vm2, %v147_v16, %v1136_v8  ;;  %v164_v20 = vsel %vm158_vm2, %v148_v15, %v1137_v0 }
  0x86   :  { %v180_v21 = vpack.c.bf16 %v166_v18, %v165_v17  ;;  %v179_v22 = vpack.c.bf16 %v164_v20, %v163_v19  ;;  %v1150_v9 = vpop.permute.xlu1 %1149  ;;  %v1145_v26 = vpop.permute.xlu0 %1144 }
  0x87   :  { %v1152_v27 = vunpack.i.h.bf16 %v1150_v9  ;;  %v1151_v11 = vunpack.i.l.bf16 %v1150_v9  ;;  %v1147_v29 = vunpack.i.h.bf16 %v1145_v26  ;;  %v1146_v30 = vunpack.i.l.bf16 %v1145_v26  ;;  %v920_v26 = vld [vmem:[%s1797_s1 + $0x80] sm:$0xff] }
  0x88   :  { %1023 = vmatprep.mubr.msk.bf16.mxu0 %vm192_vm3, %v179_v22 }
  0x89   :  { %v154_v36 = vsel %vm142_vm1, %v1402_v23, %v1152_v27  ;;  %v153_v37 = vsel %vm142_vm1, %v1412_v25, %v1151_v11  ;;  %v152_v38 = vsel %vm142_vm1, %v1381_v14, %v1147_v29  ;;  %v151_v39 = vsel %vm142_vm1, %v1366_v10, %v1146_v30  ;;  %v921_v27 = vld [vmem:[%s1797_s1 + $0x88] sm:$0xff] }
  0x8a   :  { %1024 = vmatmul.mubr.msk.bf16.gmra.mrb[4].mxu0 %vm192_vm3, %v180_v21  ;;  %v1160_v5 = vpop.permute.xlu1 %1159  ;;  %v1155_v6 = vpop.permute.xlu0 %1154  ;;  %v483_v29 = vpack.c.bf16 %v921_v27, %v920_v26 }
  0x8b   :  { %v1162_v32 = vunpack.i.h.bf16 %v1160_v5  ;;  %v1161_v33 = vunpack.i.l.bf16 %v1160_v5  ;;  %v1157_v34 = vunpack.i.h.bf16 %v1155_v6  ;;  %v1156_v35 = vunpack.i.l.bf16 %v1155_v6 }
  0x8d   :  { %v169_v40 = vsel %vm158_vm2, %v153_v37, %v1161_v33  ;;  %v170_v41 = vsel %vm158_vm2, %v154_v36, %v1162_v32  ;;  %v167_v42 = vsel %vm158_vm2, %v151_v39, %v1156_v35  ;;  %v168_v43 = vsel %vm158_vm2, %v152_v38, %v1157_v34  ;;  %v922_v32 = vld [vmem:[%s1797_s1 + $0x90] sm:$0xff]  ;;  %v923_v33 = vld [vmem:[%s1797_s1 + $0x98] sm:$0xff] }
  0x8e   :  { %v182_v44 = vpack.c.bf16 %v170_v41, %v169_v40  ;;  %v181_v45 = vpack.c.bf16 %v168_v43, %v167_v42  ;;  %v80_v23 = vpop.permute.xlu1 %79  ;;  %v1165_v46 = vpop.permute.xlu0 %1164  ;;  %v484_v36 = vpack.c.bf16 %v923_v33, %v922_v32 }
  0x8f   :  { %v1167_v47 = vunpack.i.h.bf16 %v1165_v46  ;;  %v1166_v25 = vunpack.i.l.bf16 %v1165_v46  ;;  %v157_v14 = vsel %vm142_vm1, %v1434_v31, %v80_v23 }
  0x90   :  { %1027 = vmatprep.mubr.msk.bf16.mxu0 %vm192_vm3, %v181_v45 }
  0x91   :  { %v156_v51 = vsel %vm142_vm1, %v1423_v28, %v1167_v47  ;;  %v155_v52 = vsel %vm142_vm1, %v1407_v24, %v1166_v25  ;;  %v917_v24 = vld [vmem:[%s1797_s1 + $0x68] sm:$0xff]  ;;  %v918_v28 = vld [vmem:[%s1797_s1 + $0x70] sm:$0xff]  ;;  %v924_v47 = vld [vmem:[%s1797_s1 + $0xa0] sm:$0xff] }
  0x92   :  { %1028 = vmatmul.mubr.msk.bf16.gmra.mrb[8].mxu0 %vm192_vm3, %v182_v44  ;;  %v126_v10 = vpop.permute.xlu1 %125  ;;  %v1170_v48 = vpop.permute.xlu0 %1169  ;;  %v481_v58 = vpack.c.bf16 %v917_v24, %v916_v57  ;;  %v482_v60 = vpack.c.bf16 %v919_v59, %v918_v28  ;;  %v925_v25 = vld [vmem:[%s1797_s1 + $0xa8] sm:$0xff] }
  0x93   :  { %v1172_v49 = vunpack.i.h.bf16 %v1170_v48  ;;  %v1171_v50 = vunpack.i.l.bf16 %v1170_v48  ;;  %v173_v53 = vsel %vm158_vm2, %v157_v14, %v126_v10  ;;  %v485_v48 = vpack.c.bf16 %v925_v25, %v924_v47 }
  0x94   :  { %v184_v31 = vpack.c.bf16 %v173_v53, %v173_v53  ;;  %1035 = vmatprep.subr.bf16.mxu1 %v481_v58 }
  0x95   :  { %v171_v54 = vsel %vm158_vm2, %v155_v52, %v1171_v50  ;;  %v172_v55 = vsel %vm158_vm2, %v156_v51, %v1172_v49  ;;  %1036 = vmatpush3.bf16.msra.mxu1 %v481_v58  ;;  %vm448_vm2 = vcmask 261120  }
  0x96   :  { %v183_v56 = vpack.c.bf16 %v172_v55, %v171_v54  ;;  %1037 = vmatprep.subr.bf16.mxu1 %v482_v60 }
  0x98   :  { %1031 = vmatprep.mubr.msk.bf16.mxu0 %vm192_vm3, %v183_v56  ;;  %v926_v56 = vld [vmem:[%s1797_s1 + $0xb0] sm:$0xff] }
  0x99   :  { %1038 = vmatpush3.bf16.msra.mxu1 %v482_v60 }
  0x9a   :  { %1032 = vmatmul.mubr.msk.bf16.gmra.mrb[12].mxu0 %vm192_vm3, %v184_v31  ;;  %1039 = vmatprep.subr.bf16.mxu1 %v483_v29  ;;  %v927_v31 = vld [vmem:[%s1797_s1 + $0xb8] sm:$0xff] }
  0x9b   :  { %v486_v59 = vpack.c.bf16 %v927_v31, %v926_v56 }
  0x9d   :  { %1040 = vmatpush3.bf16.msra.mxu1 %v483_v29 }
  0x9e   :  { %1041 = vmatprep.subr.bf16.mxu1 %v484_v36 }
  0xa1   :  { %1042 = vmatpush3.bf16.msra.mxu1 %v484_v36 }
  0xa2   :  { %1043 = vmatprep.subr.bf16.mxu1 %v485_v48 }
  0xa5   :  { %1044 = vmatpush3.bf16.msra.mxu1 %v485_v48 }
  0xa6   :  { %1045 = vmatprep.subr.bf16.mxu1 %v486_v59 }
  0xa9   :  { %1046 = vmatpush3.bf16.msra.mxu1 %v486_v59 }
 0x155   :  { %v1021_v62 = vpop.f32.mrb[0].mxu0 }
 0x156   :  { %v255_v63 = vpop.f32.mrb[1].mxu0  ;;  %v1524_v2 = vadd.f32 %v1021_v62, %v1521_v61 }
 0x157   :  { %v1527_v3 = vadd.f32 %v1521_v61, %v255_v63  ;;  %v1022_v1 = vpop.f32.mrb[2].mxu0 }
 0x158   :  { %v267_v4 = vadd.f32 %v1022_v1, %v1521_v61  ;;  %v258_v7 = vpop.f32.mrb[3].mxu0  ;;  %v336_v12 = vmul.f32 1.442695, %v1524_v2  ;;  %vm319_vm6 = vcmp.gt.f32.partialorder %v1524_v2, 0.0 }
 0x159   :  { %v259_v0 = vadd.f32 %v1521_v61, %v258_v7  ;;  %v332_v47 = vmul.f32 1.442695, %v1527_v3  ;;  %vm317_vm3 = vcmp.gt.f32.partialorder %v1527_v3, 0.0 }
 0x15a   :  { %v338_v8 = vmul.f32 1.442695, %v267_v4  ;;  %vm320_vm4 = vcmp.gt.f32.partialorder %v267_v4, 0.0 }
 0x15b   :  { %v334_v13 = vmul.f32 1.442695, %v259_v0  ;;  %vm318_vm5 = vcmp.gt.f32.partialorder %v259_v0, 0.0 }
 0x15c   :  { %1215 = vpow2.f32 %v338_v8 }
 0x15d   :  { %1217 = vpow2.f32 %v334_v13  ;;  %v1025_v15 = vpop.f32.mrb[4].mxu0 }
 0x15e   :  { %v271_v16 = vpop.f32.mrb[5].mxu0  ;;  %1219 = vpow2.f32 %v336_v12  ;;  %v1533_v17 = vadd.f32 %v1025_v15, %v1521_v61 }
 0x15f   :  { %v1536_v18 = vadd.f32 %v1521_v61, %v271_v16  ;;  %v1026_v19 = vpop.f32.mrb[6].mxu0 }
 0x160   :  { %v1539_v20 = vadd.f32 %v1026_v19, %v1521_v61  ;;  %v274_v21 = vpop.f32.mrb[7].mxu0  ;;  %v344_v30 = vmul.f32 1.442695, %v1533_v17  ;;  %vm323_vm10 = vcmp.gt.f32.partialorder %v1533_v17, 0.0 }
 0x161   :  { %v340_v22 = vmul.f32 1.442695, %v1536_v18  ;;  %v1543_v9 = vadd.f32 %v1521_v61, %v274_v21  ;;  %vm321_vm7 = vcmp.gt.f32.partialorder %v1536_v18, 0.0 }
 0x162   :  { %v346_v11 = vmul.f32 1.442695, %v1539_v20  ;;  %vm324_vm8 = vcmp.gt.f32.partialorder %v1539_v20, 0.0 }
 0x163   :  { %1221 = vpow2.f32 %v340_v22  ;;  %v342_v5 = vmul.f32 1.442695, %v1543_v9  ;;  %vm322_vm9 = vcmp.gt.f32.partialorder %v1543_v9, 0.0 }
 0x164   :  { %1223 = vpow2.f32 %v346_v11 }
 0x165   :  { %1225 = vpow2.f32 %v342_v5  ;;  %v1029_v6 = vpop.f32.mrb[8].mxu0 }
 0x166   :  { %v1216_v34 = vpop.eup %1215  ;;  %v287_v35 = vpop.f32.mrb[9].mxu0  ;;  %1227 = vpow2.f32 %v344_v30  ;;  %v1561_v39 = vadd.f32 %v1029_v6, %v1521_v61 }
 0x167   :  { %v1218_v37 = vpop.eup %1217  ;;  %v904_v38 = vadd.f32 -1.0, %v1216_v34  ;;  %v1564_v40 = vadd.f32 %v1521_v61, %v287_v35  ;;  %v1030_v41 = vpop.f32.mrb[10].mxu0 }
 0x168   :  { %v902_v42 = vadd.f32 -1.0, %v1218_v37  ;;  %v290_v43 = vpop.f32.mrb[11].mxu0  ;;  %v1220_v44 = vpop.eup %1219  ;;  %v1568_v23 = vadd.f32 %v1030_v41, %v1521_v61  ;;  %v352_v49 = vmul.f32 1.442695, %v1561_v39  ;;  %vm327_vm14 = vcmp.gt.f32.partialorder %v1561_v39, 0.0 }
 0x169   :  { %v348_v45 = vmul.f32 1.442695, %v1564_v40  ;;  %v1571_v46 = vadd.f32 %v1521_v61, %v290_v43  ;;  %v380_v10 = vsel %vm320_vm4, %v267_v4, %v904_v38  ;;  %v903_v51 = vadd.f32 -1.0, %v1220_v44 }
 0x16a   :  { %v378_v14 = vsel %vm318_vm5, %v259_v0, %v902_v42  ;;  %v354_v50 = vmul.f32 1.442695, %v1568_v23  ;;  %vm325_vm11 = vcmp.gt.f32.partialorder %v1564_v40, 0.0  ;;  %vm328_vm12 = vcmp.gt.f32.partialorder %v1568_v23, 0.0 }
 0x16b   :  { %1229 = vpow2.f32 %v348_v45  ;;  %v350_v52 = vmul.f32 1.442695, %v1571_v46  ;;  %v1173_v53 = vpack.i.bf16 %v380_v10, %v378_v14  ;;  %v1600_v8 = vsel %vm319_vm6, %v1524_v2, %v903_v51 }
 0x16c   :  { %1231 = vpow2.f32 %v354_v50  ;;  %vm326_vm13 = vcmp.gt.f32.partialorder %v1571_v46, 0.0  ;;  %vm456_vm4 = vcmask 523264   ;;  %vm492_vm5 = vcmask 785408  }
 0x16d   :  { %v1222_v54 = vpop.eup %1221  ;;  %v1033_v55 = vpop.f32.mrb[12].mxu0  ;;  %1233 = vpow2.f32 %v350_v52  ;;  %1174 = vrot.lane.b32.xlu0 %v1173_v53, %s1293_s6 }
 0x16e   :  { %v1224_v57 = vpop.eup %1223  ;;  %v905_v24 = vadd.f32 -1.0, %v1222_v54  ;;  %v1591_v28 = vadd.f32 %v1033_v55, %v1521_v61  ;;  %v303_v58 = vpop.f32.mrb[13].mxu0  ;;  %1235 = vpow2.f32 %v352_v49 }
 0x16f   :  { %v1226_v60 = vpop.eup %1225  ;;  %v908_v62 = vadd.f32 -1.0, %v1224_v57  ;;  %v304_v63 = vadd.f32 %v1521_v61, %v303_v58  ;;  %v1034_v1 = vpop.f32.mrb[14].mxu0 }
 0x170   :  { %v906_v4 = vadd.f32 -1.0, %v1226_v60  ;;  %v360_v7 = vmul.f32 1.442695, %v1591_v28  ;;  %v306_v0 = vpop.f32.mrb[15].mxu0  ;;  %v1605_v12 = vsel %vm321_vm7, %v1536_v18, %v905_v24  ;;  %v1228_v13 = vpop.eup %1227  ;;  %vm331_vm1 = vcmp.gt.f32.partialorder %v1591_v28, 0.0 }
 0x171   :  { %v356_v15 = vmul.f32 1.442695, %v304_v63  ;;  %v307_v16 = vadd.f32 %v1521_v61, %v306_v0  ;;  %v1178_v19 = vpack.i.bf16 %v1605_v12, %v1600_v8  ;;  %v384_v2 = vsel %vm324_vm8, %v1539_v20, %v908_v62 }
 0x172   :  { %v382_v21 = vsel %vm322_vm9, %v1543_v9, %v906_v4  ;;  %v907_v26 = vadd.f32 -1.0, %v1228_v13  ;;  %vm329_vm15 = vcmp.gt.f32.partialorder %v304_v63, 0.0 }
 0x173   :  { %1237 = vpow2.f32 %v356_v15  ;;  %v358_v18 = vmul.f32 1.442695, %v307_v16  ;;  %1179 = vrot.lane.b32.xlu0 %v1178_v19, %s1294_s0  ;;  %v1183_v22 = vpack.i.bf16 %v384_v2, %v382_v21  ;;  %vm330_vm0 = vcmp.gt.f32.partialorder %v307_v16, 0.0 }
 0x174   :  { %1239 = vpow2.f32 %v360_v7  ;;  %v383_v29 = vsel %vm323_vm10, %v1533_v17, %v907_v26 }
 0x175   :  { %v1230_v27 = vpop.eup %1229  ;;  %1241 = vpow2.f32 %v358_v18  ;;  %1184 = vrot.lane.b32.xlu1 %v1183_v22, %s1293_s6 }
 0x176   :  { %v909_v61 = vadd.f32 -1.0, %v1230_v27  ;;  %v1232_v11 = vpop.eup %1231  ;;  %1243 = vpow2.f32 %v332_v47 }
 0x177   :  { %v1234_v9 = vpop.eup %1233  ;;  %v912_v20 = vadd.f32 -1.0, %v1232_v11 }
 0x178   :  { %v1621_v30 = vsel %vm325_vm11, %v1564_v40, %v909_v61  ;;  %v1236_v5 = vpop.eup %1235  ;;  %v910_v6 = vadd.f32 -1.0, %v1234_v9  ;;  %v940_v9 = vld [vmem:[%s1797_s1 + $0xc0] sm:$0xff] }
 0x179   :  { %v1188_v32 = vpack.i.bf16 %v1621_v30, %v383_v29  ;;  %v388_v33 = vsel %vm328_vm12, %v1568_v23, %v912_v20  ;;  %v911_v35 = vadd.f32 -1.0, %v1236_v5  ;;  %v941_v20 = vld [vmem:[%s1797_s1 + $0xc8] sm:$0xff]  ;;  %v943_v5 = vld [vmem:[%s1797_s1 + $0xd8] sm:$0xff] }
 0x17a   :  { %v386_v34 = vsel %vm326_vm13, %v1571_v46, %v910_v6  ;;  %vm1296_vm13 = vmmov 0  }
 0x17b   :  { %1189 = vrot.lane.b32.xlu1 %v1188_v32, %s1294_s0  ;;  %v1193_v36 = vpack.i.bf16 %v388_v33, %v386_v34  ;;  %v387_v42 = vsel %vm327_vm14, %v1561_v39, %v911_v35  ;;  %v944_v32 = vld [vmem:[%s1797_s1 + $0xe0] sm:$0xff]  ;;  %v945_v33 = vld [vmem:[%s1797_s1 + $0xe8] sm:$0xff]  ;;  %v946_v35 = vld [vmem:[%s1797_s1 + $0xf0] sm:$0xff] }
 0x17c   :  { %v651_v34 = vpack.c.bf16 %v945_v33, %v944_v32 }
 0x17d   :  { %v1238_v17 = vpop.eup %1237  ;;  %1194 = vrot.lane.b32.xlu0 %v1193_v36, %s1293_s6  ;;  %v947_v36 = vld [vmem:[%s1797_s1 + $0xf8] sm:$0xff] }
 0x17e   :  { %v1240_v37 = vpop.eup %1239  ;;  %v913_v38 = vadd.f32 -1.0, %v1238_v17  ;;  %v652_v17 = vpack.c.bf16 %v947_v36, %v946_v35 }
 0x17f   :  { %v1242_v40 = vpop.eup %1241  ;;  %v915_v23 = vadd.f32 -1.0, %v1240_v37  ;;  %v928_v37 = vld [vmem:[%s1798_s2 + $0x1] ss:$0 sm:$0xff] }
 0x180   :  { %v914_v41 = vadd.f32 -1.0, %v1242_v40  ;;  %v389_v43 = vsel %vm329_vm15, %v304_v63, %v913_v38  ;;  %v1244_v25 = vpop.eup %1243 }
 0x181   :  { %v1198_v44 = vpack.i.bf16 %v389_v43, %v387_v42  ;;  %v391_v46 = vsel %vm331_vm1, %v1591_v28, %v915_v23  ;;  %v901_v14 = vadd.f32 -1.0, %v1244_v25 }
 0x182   :  { %v390_v45 = vsel %vm330_vm0, %v307_v16, %v914_v41 }
 0x183   :  { %411 = vrot.lane.b32.xlu1 %v390_v45, %s1293_s6  ;;  %1199 = vrot.lane.b32.xlu0 %v1198_v44, %s1294_s0  ;;  %v377_v50 = vsel %vm317_vm3, %v1527_v3, %v901_v14 }
 0x187   :  { %439 = vrot.lane.b32.xlu1 %v391_v46, %s1294_s0 }
 0x1df   :  { %v1175_v39 = vpop.permute.xlu0 %1174 }
 0x1e0   :  { %v1177_v10 = vunpack.i.h.bf16 %v1175_v39  ;;  %v1176_v48 = vunpack.i.l.bf16 %v1175_v39 }
 0x1e2   :  { %v449_v53 = vsel %vm448_vm2, %v377_v50, %v1176_v48  ;;  %v450_v54 = vsel %vm448_vm2, %v1600_v8, %v1177_v10 }
 0x1e5   :  { %v1180_v49 = vpop.permute.xlu0 %1179 }
 0x1e6   :  { %v1182_v51 = vunpack.i.h.bf16 %v1180_v49  ;;  %v1181_v52 = vunpack.i.l.bf16 %v1180_v49 }
 0x1e7   :  { %v1185_v55 = vpop.permute.xlu1 %1184 }
 0x1e8   :  { %v457_v56 = vsel %vm456_vm4, %v449_v53, %v1181_v52  ;;  %v458_v31 = vsel %vm456_vm4, %v450_v54, %v1182_v51  ;;  %v1187_v24 = vunpack.i.h.bf16 %v1185_v55  ;;  %v1186_v28 = vunpack.i.l.bf16 %v1185_v55  ;;  %v948_v52 = vld [vmem:[%s1797_s1 + $0x100] sm:$0xff]  ;;  %v949_v53 = vld [vmem:[%s1797_s1 + $0x108] sm:$0xff] }
 0x1e9   :  { %v477_v57 = vpack.c.bf16 %v458_v31, %v457_v56  ;;  %v653_v56 = vpack.c.bf16 %v949_v53, %v948_v52 }
 0x1ea   :  { %v452_v60 = vsel %vm448_vm2, %v383_v29, %v1187_v24  ;;  %v451_v62 = vsel %vm448_vm2, %v1605_v12, %v1186_v28  ;;  %v942_v29 = vld [vmem:[%s1797_s1 + $0xd0] sm:$0xff] }
 0x1eb   :  { %1047 = vmatprep.mubr.msk.bf16.mxu1 %vm492_vm5, %v477_v57  ;;  %v650_v6 = vpack.c.bf16 %v943_v5, %v942_v29 }
 0x1ed   :  { %v1190_v58 = vpop.permute.xlu1 %1189 }
 0x1ee   :  { %v1192_v3 = vunpack.i.h.bf16 %v1190_v58  ;;  %v1191_v59 = vunpack.i.l.bf16 %v1190_v58 }
 0x1ef   :  { %v1195_v4 = vpop.permute.xlu0 %1194 }
 0x1f0   :  { %v459_v63 = vsel %vm456_vm4, %v451_v62, %v1191_v59  ;;  %v460_v1 = vsel %vm456_vm4, %v452_v60, %v1192_v3  ;;  %v1197_v0 = vunpack.i.h.bf16 %v1195_v4  ;;  %v1196_v8 = vunpack.i.l.bf16 %v1195_v4  ;;  %v950_v59 = vld [vmem:[%s1797_s1 + $0x110] sm:$0xff]  ;;  %v951_v60 = vld [vmem:[%s1797_s1 + $0x118] sm:$0xff] }
 0x1f1   :  { %v478_v7 = vpack.c.bf16 %v460_v1, %v459_v63  ;;  %v654_v63 = vpack.c.bf16 %v951_v60, %v950_v59  ;;  %v968_v59 = vld [vmem:[%s1797_s1 + $0x170] sm:$0xff]  ;;  %v969_v60 = vld [vmem:[%s1797_s1 + $0x178] sm:$0xff] }
 0x1f2   :  { %v454_v21 = vsel %vm448_vm2, %v387_v42, %v1197_v0  ;;  %v453_v2 = vsel %vm448_vm2, %v1621_v30, %v1196_v8  ;;  %v649_v30 = vpack.c.bf16 %v941_v20, %v940_v9 }
 0x1f3   :  { %1048 = vmatmul.mubr.msk.bf16.vlgmr.msra.gmra.mrb[0].mxu1 %vm492_vm5, %v478_v7 }
 0x1f4   :  { %1055 = vmatprep.subr.bf16.mxu0 %v649_v30 }
 0x1f5   :  { %v412_v13 = vpop.permute.xlu1 %411  ;;  %v1200_v15 = vpop.permute.xlu0 %1199  ;;  %1056 = vmatpush3.bf16.msra.mxu0 %v649_v30 }
 0x1f6   :  { %v1202_v16 = vunpack.i.h.bf16 %v1200_v15  ;;  %v1201_v19 = vunpack.i.l.bf16 %v1200_v15  ;;  %v455_v22 = vsel %vm448_vm2, %v389_v43, %v412_v13  ;;  %1057 = vmatprep.subr.bf16.mxu0 %v650_v6 }
 0x1f8   :  { %v461_v12 = vsel %vm456_vm4, %v453_v2, %v1201_v19  ;;  %v462_v18 = vsel %vm456_vm4, %v454_v21, %v1202_v16 }
 0x1f9   :  { %v479_v26 = vpack.c.bf16 %v462_v18, %v461_v12  ;;  %v440_v27 = vpop.permute.xlu1 %439  ;;  %1058 = vmatpush3.bf16.msra.mxu0 %v650_v6 }
 0x1fa   :  { %v463_v61 = vsel %vm456_vm4, %v455_v22, %v440_v27  ;;  %1059 = vmatprep.subr.bf16.mxu0 %v651_v34 }
 0x1fb   :  { %v480_v11 = vpack.c.bf16 %v463_v61, %v463_v61  ;;  %1051 = vmatprep.mubr.msk.bf16.mxu1 %vm492_vm5, %v479_v26 }
 0x1fd   :  { %1052 = vmatmul.mubr.msk.bf16.gmra.mrb[4].mxu1 %vm492_vm5, %v480_v11  ;;  %1060 = vmatpush3.bf16.msra.mxu0 %v651_v34 }
 0x1fe   :  { %1061 = vmatprep.subr.bf16.mxu0 %v652_v17 }
 0x201   :  { %1062 = vmatpush3.bf16.msra.mxu0 %v652_v17 }
 0x202   :  { %1063 = vmatprep.subr.bf16.mxu0 %v653_v56 }
 0x205   :  { %1064 = vmatpush3.bf16.msra.mxu0 %v653_v56 }
 0x206   :  { %1065 = vmatprep.subr.bf16.mxu0 %v654_v63 }
 0x209   :  { %1066 = vmatpush3.bf16.msra.mxu0 %v654_v63 }
 0x2c6   :  { %v1049_v38 = vpop.f32.mrb[0].mxu1 }
 0x2c7   :  { %v539_v40 = vpop.f32.mrb[1].mxu1  ;;  %v548_v45 = vadd.f32 %v1049_v38, %v928_v37 }
 0x2c8   :  { %v1688_v41 = vadd.f32 %v928_v37, %v539_v40  ;;  %v1050_v42 = vpop.f32.mrb[2].mxu1 }
 0x2c9   :  { %v551_v43 = vadd.f32 %v1050_v42, %v928_v37  ;;  %v542_v44 = vpop.f32.mrb[3].mxu1  ;;  %v580_v25 = vmul.f32 1.442695, %v548_v45  ;;  %vm571_vm8 = vcmp.gt.f32.partialorder %v548_v45, 0.0 }
 0x2ca   :  { %v543_v23 = vadd.f32 %v928_v37, %v542_v44  ;;  %v576_v26 = vmul.f32 1.442695, %v1688_v41  ;;  %vm569_vm12 = vcmp.gt.f32.partialorder %v1688_v41, 0.0  ;;  %v960_v44 = vld [vmem:[%s1797_s1 + $0x130] sm:$0xff] }
 0x2cb   :  { %v582_v46 = vmul.f32 1.442695, %v551_v43  ;;  %vm572_vm6 = vcmp.gt.f32.partialorder %v551_v43, 0.0 }
 0x2cc   :  { %v578_v47 = vmul.f32 1.442695, %v543_v23  ;;  %vm570_vm7 = vcmp.gt.f32.partialorder %v543_v23, 0.0 }
 0x2cd   :  { %1245 = vpow2.f32 %v582_v46  ;;  %v961_v46 = vld [vmem:[%s1797_s1 + $0x138] sm:$0xff] }
 0x2ce   :  { %1247 = vpow2.f32 %v578_v47  ;;  %v754_v47 = vpack.c.bf16 %v961_v46, %v960_v44 }
 0x2cf   :  { %1249 = vpow2.f32 %v580_v25  ;;  %v962_v25 = vld [vmem:[%s1797_s1 + $0x140] sm:$0xff] }
 0x2d0   :  { %v1053_v39 = vpop.f32.mrb[4].mxu1 }
 0x2d1   :  { %v564_v14 = vadd.f32 %v1053_v39, %v928_v37  ;;  %v555_v10 = vpop.f32.mrb[5].mxu1  ;;  %v963_v39 = vld [vmem:[%s1797_s1 + $0x148] sm:$0xff] }
 0x2d2   :  { %v556_v48 = vadd.f32 %v928_v37, %v555_v10  ;;  %v1054_v49 = vpop.f32.mrb[6].mxu1  ;;  %v964_v10 = vld [vmem:[%s1797_s1 + $0x150] sm:$0xff] }
 0x2d3   :  { %v588_v50 = vmul.f32 1.442695, %v564_v14  ;;  %v558_v51 = vpop.f32.mrb[7].mxu1  ;;  %vm575_vm11 = vcmp.gt.f32.partialorder %v564_v14, 0.0 }
 0x2d4   :  { %v584_v54 = vmul.f32 1.442695, %v556_v48  ;;  %v559_v55 = vadd.f32 %v928_v37, %v558_v51  ;;  %vm573_vm9 = vcmp.gt.f32.partialorder %v556_v48, 0.0 }
 0x2d6   :  { %1251 = vpow2.f32 %v584_v54  ;;  %v586_v31 = vmul.f32 1.442695, %v559_v55  ;;  %vm574_vm10 = vcmp.gt.f32.partialorder %v559_v55, 0.0 }
 0x2d7   :  { %v1246_v57 = vpop.eup %1245  ;;  %1253 = vpow2.f32 %v588_v50  ;;  %v952_v50 = vld [vmem:[%s1798_s2 + $0x2] ss:$0 sm:$0xff] }
 0x2d8   :  { %v1248_v24 = vpop.eup %1247  ;;  %v936_v28 = vadd.f32 -1.0, %v1246_v57  ;;  %1255 = vpow2.f32 %v586_v31 }
 0x2d9   :  { %v934_v58 = vadd.f32 -1.0, %v1248_v24  ;;  %v1250_v1 = vpop.eup %1249  ;;  %1257 = vpow2.f32 %v576_v26  ;;  %v966_v24 = vld [vmem:[%s1797_s1 + $0x160] sm:$0xff] }
 0x2da   :  { %v600_v3 = vsel %vm572_vm6, %v551_v43, %v936_v28  ;;  %v935_v7 = vadd.f32 -1.0, %v1250_v1  ;;  %v959_v43 = vld [vmem:[%s1797_s1 + $0x128] sm:$0xff]  ;;  %v1213_v26 = vld [vmem:[%s1799_s3] sm:$0xff]  }
 0x2db   :  { %v598_v62 = vsel %vm570_vm7, %v543_v23, %v934_v58  ;;  %v967_v28 = vld [vmem:[%s1797_s1 + $0x168] sm:$0xff] }
 0x2dc   :  { %v1203_v4 = vpack.i.bf16 %v600_v3, %v598_v62  ;;  %v599_v19 = vsel %vm571_vm8, %v548_v45, %v935_v7  ;;  %v1295_v45 = vmov 0.0   ;;  %v757_v58 = vpack.c.bf16 %v967_v28, %v966_v24 }
 0x2dd   :  { %1071 = vmatprep.subr.bf16.mxu1 %v1295_v45  ;;  %1087 = vmatprep.subr.bf16.mxu0 %v1295_v45  ;;  %v758_v62 = vpack.c.bf16 %v969_v60, %v968_v59 }
 0x2de   :  { %1204 = vrot.lane.b32.xlu0 %v1203_v4, %s1293_s6  ;;  %1083 = vmatprep.mubr.msk.bf16.mxu1 %vm1296_vm13, %v1295_v45 }
 0x2e0   :  { %v1252_v0 = vpop.eup %1251 }
 0x2e1   :  { %v1254_v8 = vpop.eup %1253  ;;  %v937_v13 = vadd.f32 -1.0, %v1252_v0 }
 0x2e2   :  { %v1256_v15 = vpop.eup %1255  ;;  %v939_v18 = vadd.f32 -1.0, %v1254_v8 }
 0x2e3   :  { %v938_v16 = vadd.f32 -1.0, %v1256_v15  ;;  %v601_v21 = vsel %vm573_vm9, %v556_v48, %v937_v13  ;;  %v1258_v27 = vpop.eup %1257  ;;  %v965_v48 = vld [vmem:[%s1797_s1 + $0x158] sm:$0xff] }
 0x2e4   :  { %v1208_v2 = vpack.i.bf16 %v601_v21, %v599_v19  ;;  %v603_v22 = vsel %vm575_vm11, %v564_v14, %v939_v18  ;;  %v933_v11 = vadd.f32 -1.0, %v1258_v27  ;;  %v755_v14 = vpack.c.bf16 %v963_v39, %v962_v25  ;;  %v1214_v27 = vld [vmem:[%s1799_s3 + $0x8] sm:$0xff]  }
 0x2e5   :  { %v602_v12 = vsel %vm574_vm10, %v559_v55, %v938_v16  ;;  %v756_v49 = vpack.c.bf16 %v965_v48, %v964_v10 }
 0x2e6   :  { %611 = vrot.lane.b32.xlu1 %v602_v12, %s1293_s6  ;;  %1209 = vrot.lane.b32.xlu0 %v1208_v2, %s1294_s0  ;;  %v597_v5 = vsel %vm569_vm12, %v1688_v41, %v933_v11  ;;  %v958_v41 = vld [vmem:[%s1797_s1 + $0x120] sm:$0xff] }
 0x2e7   :  { %v753_v23 = vpack.c.bf16 %v959_v43, %v958_v41 }
 0x2e9   :  { %1072 = vmatpush3.bf16.msra.mxu1 %v753_v23 }
 0x2ea   :  { %623 = vrot.lane.b32.xlu1 %v603_v22, %s1294_s0  ;;  %1073 = vmatprep.subr.bf16.mxu1 %v1295_v45 }
 0x2ed   :  { %1074 = vmatpush3.bf16.msra.mxu1 %v754_v47 }
 0x2ee   :  { %1075 = vmatprep.subr.bf16.mxu1 %v1295_v45 }
 0x2f1   :  { %1076 = vmatpush3.bf16.msra.mxu1 %v755_v14 }
 0x2f2   :  { %1077 = vmatprep.subr.bf16.mxu1 %v1295_v45 }
 0x2f5   :  { %1078 = vmatpush3.bf16.msra.mxu1 %v756_v49 }
 0x2f6   :  { %1079 = vmatprep.subr.bf16.mxu1 %v1295_v45 }
 0x2f9   :  { %1080 = vmatpush3.bf16.msra.mxu1 %v757_v58 }
 0x2fa   :  { %1081 = vmatprep.subr.bf16.mxu1 %v1295_v45 }
 0x2fd   :  { %1082 = vmatpush3.bf16.msra.mxu1 %v758_v62 }
 0x350   :  { %v1205_v61 = vpop.permute.xlu0 %1204 }
 0x351   :  { %v1207_v9 = vunpack.i.h.bf16 %v1205_v61  ;;  %v1206_v20 = vunpack.i.l.bf16 %v1205_v61  ;;  %v970_v61 = vld [vmem:[%s1798_s2 + $0x3] ss:$0 sm:$0xff] }
 0x353   :  { %v629_v33 = vsel %vm448_vm2, %v599_v19, %v1207_v9  ;;  %v628_v34 = vsel %vm448_vm2, %v597_v5, %v1206_v20 }
 0x358   :  { %v612_v29 = vpop.permute.xlu1 %611  ;;  %v1210_v30 = vpop.permute.xlu0 %1209 }
 0x359   :  { %v1212_v6 = vunpack.i.h.bf16 %v1210_v30  ;;  %v1211_v32 = vunpack.i.l.bf16 %v1210_v30  ;;  %v630_v17 = vsel %vm448_vm2, %v601_v21, %v612_v29 }
 0x35b   :  { %v631_v35 = vsel %vm456_vm4, %v628_v34, %v1211_v32  ;;  %v632_v36 = vsel %vm456_vm4, %v629_v33, %v1212_v6 }
 0x35c   :  { %v647_v37 = vpack.c.bf16 %v632_v36, %v631_v35  ;;  %v624_v38 = vpop.permute.xlu1 %623  ;;  %v973_v35 = vld [vmem:[%s1798_s2 + $0x4] ss:$0 sm:$0xff] }
 0x35d   :  { %v633_v40 = vsel %vm456_vm4, %v630_v17, %v624_v38 }
 0x35e   :  { %v648_v42 = vpack.c.bf16 %v633_v40, %v633_v40  ;;  %1067 = vmatprep.mubr.msk.bf16.mxu0 %vm492_vm5, %v647_v37 }
 0x360   :  { %1068 = vmatmul.mubr.msk.bf16.vlgmr.msra.gmra.mrb[16].mxu0 %vm492_vm5, %v648_v42 }
 0x361   :  { %1091 = vmatprep.mubr.msk.bf16.mxu0 %vm1296_vm13, %v1295_v45  ;;  %1088 = vmatpush3.bf16.msra.mxu0 %v1213_v26 }
 0x362   :  { %1089 = vmatprep.subr.bf16.mxu0 %v1295_v45 }
 0x365   :  { %1090 = vmatpush3.bf16.msra.mxu0 %v1214_v27 }
 0x433   :  { %v1069_v51 = vpop.f32.mrb[16].mxu0 }
 0x434   :  { %v709_v52 = vadd.f32 %v1069_v51, %v952_v50  ;;  %v700_v53 = vpop.f32.mrb[17].mxu0 }
 0x435   :  { %v701_v54 = vadd.f32 %v952_v50, %v700_v53  ;;  %v1070_v55 = vpop.f32.mrb[18].mxu0 }
 0x436   :  { %v721_v56 = vmul.f32 1.442695, %v709_v52  ;;  %v703_v31 = vpop.f32.mrb[19].mxu0  ;;  %vm716_vm14 = vcmp.gt.f32.partialorder %v709_v52, 0.0 }
 0x437   :  { %v704_v57 = vadd.f32 %v952_v50, %v703_v31  ;;  %v717_v13 = vmul.f32 1.442695, %v701_v54  ;;  %vm714_vm0 = vcmp.gt.f32.partialorder %v701_v54, 0.0 }
 0x438   :  { %1259 = vpow2.f32 %v721_v56 }
 0x439   :  { %v719_v3 = vmul.f32 1.442695, %v704_v57  ;;  %vm715_vm15 = vcmp.gt.f32.partialorder %v704_v57, 0.0 }
 0x43b   :  { %1261 = vpow2.f32 %v719_v3 }
 0x43c   :  { %1263 = vpow2.f32 %v717_v13 }
 0x442   :  { %v1260_v63 = vpop.eup %1259 }
 0x443   :  { %v957_v1 = vadd.f32 -1.0, %v1260_v63 }
 0x445   :  { %v1262_v4 = vpop.eup %1261  ;;  %v728_v7 = vsel %vm716_vm14, %v709_v52, %v957_v1 }
 0x446   :  { %734 = vrot.lane.b32.xlu1 %v728_v7, %s1294_s0  ;;  %v956_v0 = vadd.f32 -1.0, %v1262_v4  ;;  %v1264_v15 = vpop.eup %1263 }
 0x447   :  { %v955_v16 = vadd.f32 -1.0, %v1264_v15 }
 0x448   :  { %v727_v8 = vsel %vm715_vm15, %v704_v57, %v956_v0 }
 0x449   :  { %730 = vrot.lane.b32.xlu0 %v727_v8, %s1293_s6  ;;  %v726_v21 = vsel %vm714_vm0, %v701_v54, %v955_v16 }
 0x4b8   :  { %v735_v2 = vpop.permute.xlu1 %734 }
 0x4bb   :  { %v731_v19 = vpop.permute.xlu0 %730 }
 0x4bc   :  { %v737_v12 = vsel %vm448_vm2, %v726_v21, %v731_v19 }
 0x4bd   :  { %v738_v18 = vsel %vm456_vm4, %v737_v12, %v735_v2 }
 0x4be   :  { %v752_v22 = vpack.c.bf16 %v738_v18, %v738_v18 }
 0x4c0   :  { %1084 = vmatmul.mubr.msk.bf16.vlgmr.msra.gmra.mrb[8].mxu1 %vm492_vm5, %v752_v22 }
 0x593   :  { %v801_v11 = vpop.f32.mrb[8].mxu1 }
 0x594   :  { %v802_v9 = vadd.f32 %v970_v61, %v801_v11  ;;  %v1085_v20 = vpop.f32.mrb[9].mxu1 }
 0x595   :  { %v804_v29 = vpop.f32.mrb[10].mxu1 }
 0x596   :  { %v808_v30 = vmul.f32 1.442695, %v802_v9  ;;  %v1086_v5 = vpop.f32.mrb[11].mxu1  ;;  %vm807_vm1 = vcmp.gt.f32.partialorder %v802_v9, 0.0 }
 0x598   :  { %1265 = vpow2.f32 %v808_v30 }
 0x5a2   :  { %v1266_v6 = vpop.eup %1265 }
 0x5a3   :  { %v972_v32 = vadd.f32 -1.0, %v1266_v6 }
 0x5a5   :  { %v811_v33 = vsel %vm807_vm1, %v802_v9, %v972_v32 }
 0x5a6   :  { %v812_v34 = vpack.c.bf16 %v811_v33, %v811_v33 }
 0x5a8   :  { %1092 = vmatmul.mubr.msk.bf16.vlgmr.msra.gmra.mrb[20].mxu0 %vm448_vm2, %v812_v34 }
 0x67b   :  { %v871_v36 = vpop.f32.mrb[20].mxu0 }
 0x67c   :  { %v872_v17 = vadd.f32 %v973_v35, %v871_v36  ;;  %v1093_v37 = vpop.f32.mrb[21].mxu0 }
 0x67d   :  { %v874_v38 = vpop.f32.mrb[22].mxu0 }
 0x67e   :  { %877 = vst [vmem:[#allocation2] sm:$0xff] %v872_v17  ;;  %v1094_v40 = vpop.f32.mrb[23].mxu0 }
 0x67f   :  { %1278 = shalt.err (!%p1275_p4)
}
 0x680   :  { %s1279_s2 = scalar_lea.hbm %s1800_s4, 128 }
 0x681   :  { %p1280_p5 = scmp.ne.s32.totalorder %s1800_s4, %s1279_s2  ;;  %p1283_p6 = scmp.lt.u32.totalorder %s1279_s2, %s1800_s4 }
 0x683   :  { %p1285_p7 = pnand %p1283_p6, %p1280_p5 }
 0x685   :  { %1288 = shalt.err (!%p1285_p7)
}
 0x686   :  { %887 = dma.vmem_to_hbm [thread:$0]  %s885_s12, 128, %s1800_s4, [#allocation3]  }
 0x687   :  { %1289 = dma.done.wait [#allocation3], 128  }
 0x688   :  { %1290 = vsyncadd [#allocation3], 4294967168 }
 0x689   :  { %891 = vsyncpa [#allocation3], 1 }

</bundles_post_ra>
